<compile_context>
chip_gen: v6e
topology: v6e:2x2x1
jax: 0.10.0
libtpu: 0.0.40
codegen_flags: <defaults>
</compile_context>

<pallas_src>
import functools

import jax
import jax.numpy as jnp
from jax import lax
from jax.experimental import pallas as pl
from jax.experimental.pallas import tpu as pltpu


def _round_up(x, m):
    return ((x + m - 1) // m) * m


def _critic_kernel(x_ref, w1_ref, b1_ref, w2_ref, b2_ref, w3_ref, b3_ref,
                   out_ref, acc_ref, *, true_l, padded_l, use_bf16, fc1_bf16):
    b_tile, l_tile = x_ref.shape
    hidden = w1_ref.shape[0]
    n_ch = w2_ref.shape[0]                     # 20

    l_idx = pl.program_id(1)
    n_l = pl.num_programs(1)

    cdt = jnp.bfloat16 if fc1_bf16 else jnp.float32   # fc1 (VPU) compute dtype
    mdt = jnp.bfloat16 if use_bf16 else jnp.float32   # MXU operand dtype

    # Zero the per-position accumulator at the start of each L sweep.
    @pl.when(l_idx == 0)
    def _():
        acc_ref[...] = jnp.zeros_like(acc_ref)

    # Hoisted broadcasts / casts (JAX does not CSE broadcast_in_dim inside the
    # row loop below).
    w1_b = jnp.broadcast_to(w1_ref[...].astype(cdt), (hidden, l_tile))   # (H, l)
    b1_b = jnp.broadcast_to(b1_ref[...].astype(cdt), (hidden, l_tile))   # (H, l)
    b2_b = jnp.broadcast_to(b2_ref[...], (n_ch, l_tile))                 # (20, l) f32
    w2 = w2_ref[...]                          # (20, H), pre-cast to mdt in wrapper
    w3 = w3_ref[...]                          # (1, 20)  f32

    # Row-at-a-time pipeline: L stays in lanes end to end, the live set stays
    # small, and all slice indices are static (no dynamic minor-dim indexing).
    for b in range(b_tile):
        x_row = x_ref[pl.ds(b, 1), :].astype(cdt)                   # (1, l_tile)
        h1 = jnp.maximum(x_row * w1_b + b1_b, 0.0).astype(mdt)      # (H, l_tile)
        h2 = jnp.dot(w2, h1, preferred_element_type=jnp.float32)    # (20, l_tile)
        h2 = jnp.maximum(h2 + b2_b, 0.0)
        # fc3 channel collapse on the (otherwise idle) MXU -> lane-dense row.
        y_row = jnp.dot(w3, h2, preferred_element_type=jnp.float32)  # (1, l_tile)
        acc_ref[pl.ds(b, 1), :] += y_row

    @pl.when(l_idx == n_l - 1)
    def _():
        # Analytic correction for zero-padded L positions (x == 0):
        #   y_pad = w3 . relu(w2 @ relu(b1) + b2), subtracted pad_l times.
        pad_l = padded_l - true_l
        bias_term = float(true_l) * b3_ref[...]                      # (1, 1)
        if pad_l > 0:
            h1p = jnp.maximum(b1_ref[...].astype(cdt), 0.0).astype(mdt)   # (H, 1)
            h2p = jnp.maximum(
                jnp.dot(w2, h1p, preferred_element_type=jnp.float32)
                + b2_ref[...], 0.0)                                  # (20, 1)
            y_pad = jnp.dot(w3, h2p, preferred_element_type=jnp.float32)  # (1, 1)
            bias_term = bias_term - float(pad_l) * y_pad
        # Single XLU lane reduce over positions; output already in (b_tile, 1).
        out_ref[...] = jnp.sum(acc_ref[...], axis=1, keepdims=True) + bias_term


def critic_forward(x, params, *, b_tile=None, l_tile=None,
                   use_bf16=True, fc1_bf16=None):
    if fc1_bf16 is None:
        fc1_bf16 = use_bf16     # on v5e (no bf16 VPU) pass fc1_bf16=False
    B, L = x.shape
    H = params["w1"].shape[0]
    C = params["w2"].shape[0]   # 20

    # Tile choices: L (lanes) in multiples of 128, capped at 512 (v7x VMEM /
    # register pressure); B (sublanes) in multiples of 8, chosen so the
    # "parallel" axis has >=2 blocks whenever B >= 16 (megacore on v7x).
    if l_tile is None:
        l_tile = min(512, _round_up(L, 128))
    if b_tile is None:
        b_pad8 = _round_up(B, 8)
        b_tile = 8 if b_pad8 <= 8 else min(32, _round_up(b_pad8 // 2, 8))

    B_pad = _round_up(B, b_tile)
    L_pad = _round_up(L, l_tile)
    x_p = x if (B_pad, L_pad) == (B, L) else jnp.pad(
        x, ((0, B_pad - B), (0, L_pad - L)))

    # Pre-cast fc2 weights once in the wrapper (no per-step cast in the kernel).
    w2 = params["w2"].astype(jnp.bfloat16) if use_bf16 else params["w2"]

    grid = (B_pad // b_tile, L_pad // l_tile)
    kernel = functools.partial(_critic_kernel, true_l=L, padded_l=L_pad,
                               use_bf16=use_bf16, fc1_bf16=fc1_bf16)

    flops = 2 * B * L * H * C + 3 * B * L * H + 2 * B * L * C
    bytes_accessed = 4 * (B * L + B + 2 * H + H * C + 2 * C + 1)

    out = pl.pallas_call(
        kernel,
        out_shape=jax.ShapeDtypeStruct((B_pad, 1), jnp.float32),
        grid_spec=pltpu.PrefetchScalarGridSpec(
            num_scalar_prefetch=0,
            grid=grid,
            in_specs=[
                # x: tiled over (B, L)
                pl.BlockSpec((b_tile, l_tile), lambda b, l: (b, l)),
                # weights/biases: full-array blocks, constant index -> resident
                pl.BlockSpec((H, 1), lambda b, l: (0, 0)),    # w1
                pl.BlockSpec((H, 1), lambda b, l: (0, 0)),    # b1
                pl.BlockSpec((C, H), lambda b, l: (0, 0)),    # w2
                pl.BlockSpec((C, 1), lambda b, l: (0, 0)),    # b2
                pl.BlockSpec((1, C), lambda b, l: (0, 0)),    # w3
                pl.BlockSpec((1, 1), lambda b, l: (0, 0)),    # b3
            ],
            # Output block index is constant along the L (reduction) axis:
            # written only at l == n_l - 1.
            out_specs=pl.BlockSpec((b_tile, 1), lambda b, l: (b, 0)),
            scratch_shapes=[pltpu.VMEM((b_tile, l_tile), jnp.float32)],
        ),
        compiler_params=pltpu.CompilerParams(
            dimension_semantics=("parallel", "arbitrary"),
            vmem_limit_bytes=32 * 1024 * 1024,
        ),
        cost_estimate=pl.CostEstimate(
            flops=flops, transcendentals=0, bytes_accessed=bytes_accessed),
    )(x_p, params["w1"], params["b1"], w2, params["b2"],
      params["w3"], params["b3"])

    return out[:B]


def init_params(key, hidden_size):
    """Deterministic xavier-uniform weights / fan_in-uniform biases (torch Conv1d style)."""
    ks = jax.random.split(key, 6)

    def xavier(k, shape, fan_in, fan_out):
        bound = (6.0 / (fan_in + fan_out)) ** 0.5
        return jax.random.uniform(k, shape, jnp.float32, -bound, bound)

    def bias(k, shape, fan_in):
        bound = 1.0 / (fan_in ** 0.5)
        return jax.random.uniform(k, shape, jnp.float32, -bound, bound)

    H = hidden_size
    return {
        # fc1: Conv1d(1, H, 1)  weight (H, 1, 1) -> stored as (H, 1)
        "w1": xavier(ks[0], (H, 1), fan_in=1, fan_out=H),
        "b1": bias(ks[1], (H, 1), fan_in=1),
        # fc2: Conv1d(H, 20, 1) weight (20, H, 1) -> stored as (20, H)
        "w2": xavier(ks[2], (20, H), fan_in=H, fan_out=20),
        "b2": bias(ks[3], (20, 1), fan_in=H),
        # fc3: Conv1d(20, 1, 1) weight (1, 20, 1) -> stored as (1, 20)
        "w3": xavier(ks[4], (1, 20), fan_in=20, fan_out=1),
        "b3": bias(ks[5], (1, 1), fan_in=20),
    }


def critic_reference(x, params):
    """Pure-JAX reference matching the PyTorch forward exactly (f32, highest precision)."""
    hp = lax.Precision.HIGHEST
    h1 = jax.nn.relu(x[:, :, None] * params["w1"][:, 0][None, None, :]
                     + params["b1"][:, 0][None, None, :])            # (B, L, H)
    h2 = jax.nn.relu(jnp.einsum("blh,ch->blc", h1, params["w2"], precision=hp)
                     + params["b2"][:, 0][None, None, :])            # (B, L, 20)
    y = jnp.einsum("blc,c->bl", h2, params["w3"][0], precision=hp) \
        + params["b3"][0, 0]                                         # (B, L)
    return jnp.sum(y, axis=1, keepdims=True)                         # (B, 1)


def _check(x, params):
    ref = critic_reference(x, params)
    B = x.shape[0]

    # f32 matmul path: tight check.
    out_f32 = jax.block_until_ready(
        critic_forward(x, params, use_bf16=False, fc1_bf16=False))
    assert out_f32.shape == (B, 1), out_f32.shape
    assert jnp.allclose(out_f32, ref, atol=1e-3, rtol=1e-3), (out_f32, ref)

    # bf16 production path (bf16 fc1 + bf16 MXU operands, f32 accumulation).
    out_bf16 = jax.block_until_ready(critic_forward(x, params, use_bf16=True))
    assert out_bf16.shape == (B, 1), out_bf16.shape
    assert jnp.allclose(out_bf16, ref, atol=5e-2, rtol=5e-2), (out_bf16, ref)


if __name__ == "__main__":
    key = jax.random.PRNGKey(0)
    k_param, k_x1, k_x2 = jax.random.split(key, 3)

    HIDDEN = 32
    params = init_params(k_param, HIDDEN)

    # Small shape (matches the PyTorch forward's (B, L) input).
    _check(jax.random.normal(k_x1, (2, 8), jnp.float32), params)

    # Slightly larger shape: exercises multi-tile grid, L accumulation across
    # grid steps, the analytic pad correction and >=2 parallel B blocks.
    _check(jax.random.normal(k_x2, (20, 700), jnp.float32), params)

    print("KERNEL_OK")
</pallas_src>

<mosaic_0001>
module attributes {stable_mosaic.version = 11 : i64} {
  func.func @_critic_kernel(%arg0: i32, %arg1: i32, %arg2: memref<8x128xf32, #tpu.memory_space<vmem>>, %arg3: memref<32x1xf32, #tpu.memory_space<vmem>>, %arg4: memref<32x1xf32, #tpu.memory_space<vmem>>, %arg5: memref<20x32xf32, #tpu.memory_space<vmem>>, %arg6: memref<20x1xf32, #tpu.memory_space<vmem>>, %arg7: memref<1x20xf32, #tpu.memory_space<vmem>>, %arg8: memref<1x1xf32, #tpu.memory_space<vmem>>, %arg9: memref<8x1xf32, #tpu.memory_space<vmem>>, %arg10: memref<8x128xf32, #tpu.memory_space<vmem>>) attributes {dimension_semantics = [#tpu.dimension_semantics<parallel>, #tpu.dimension_semantics<arbitrary>], iteration_bounds = array<i64: 1, 1>, scalar_prefetch = 0 : i64, scratch_operands = 1 : i64, tpu.core_type = #tpu.core_type<tc>, window_params = [{transform_indices = @transform_0, window_bounds = array<i64: 8, 128>}, {pipeline_mode = #tpu.pipeline_mode<synchronous>, transform_indices = @transform_1, window_bounds = array<i64: 32, 1>}, {pipeline_mode = #tpu.pipeline_mode<synchronous>, transform_indices = @transform_2, window_bounds = array<i64: 32, 1>}, {pipeline_mode = #tpu.pipeline_mode<synchronous>, transform_indices = @transform_3, window_bounds = array<i64: 20, 32>}, {pipeline_mode = #tpu.pipeline_mode<synchronous>, transform_indices = @transform_4, window_bounds = array<i64: 20, 1>}, {pipeline_mode = #tpu.pipeline_mode<synchronous>, transform_indices = @transform_5, window_bounds = array<i64: 1, 20>}, {pipeline_mode = #tpu.pipeline_mode<synchronous>, transform_indices = @transform_6, window_bounds = array<i64: 1, 1>}, {transform_indices = @transform_7, window_bounds = array<i64: 8, 1>}]} {
    %c0_i32 = arith.constant 0 : i32
    %0 = arith.cmpi eq, %arg1, %c0_i32 : i32
    %1 = arith.extui %0 : i1 to i32
    %c0_i32_0 = arith.constant 0 : i32
    %2 = arith.cmpi ne, %1, %c0_i32_0 : i32
    scf.if %2 {
      %cst_84 = arith.constant 0.000000e+00 : f32
      %129 = vector.broadcast %cst_84 : f32 to vector<8x128xf32>
      %c0_85 = arith.constant 0 : index
      %c0_86 = arith.constant 0 : index
      %130 = vector.load %arg10[%c0_85, %c0_86] : memref<8x128xf32, #tpu.memory_space<vmem>>, vector<8x128xf32>
      tpu.vector_store %arg10[%c0_85, %c0_86], %129 {strides = array<i32>} : memref<8x128xf32, #tpu.memory_space<vmem>>, vector<8x128xf32>,
    } else {
    }
    %c0 = arith.constant 0 : index
    %c0_1 = arith.constant 0 : index
    %3 = vector.load %arg3[%c0, %c0_1] : memref<32x1xf32, #tpu.memory_space<vmem>>, vector<32x1xf32>
    %4 = vector.shape_cast %3 : vector<32x1xf32> to vector<32x1xf32>
    %5 = vector.broadcast %4 : vector<32x1xf32> to vector<32x128xf32>
    %c0_2 = arith.constant 0 : index
    %c0_3 = arith.constant 0 : index
    %6 = vector.load %arg4[%c0_2, %c0_3] : memref<32x1xf32, #tpu.memory_space<vmem>>, vector<32x1xf32>
    %7 = vector.shape_cast %6 : vector<32x1xf32> to vector<32x1xf32>
    %8 = vector.broadcast %7 : vector<32x1xf32> to vector<32x128xf32>
    %c0_4 = arith.constant 0 : index
    %c0_5 = arith.constant 0 : index
    %9 = vector.load %arg6[%c0_4, %c0_5] : memref<20x1xf32, #tpu.memory_space<vmem>>, vector<20x1xf32>
    %10 = vector.shape_cast %9 : vector<20x1xf32> to vector<20x1xf32>
    %11 = vector.broadcast %10 : vector<20x1xf32> to vector<20x128xf32>
    %c0_6 = arith.constant 0 : index
    %c0_7 = arith.constant 0 : index
    %12 = vector.load %arg5[%c0_6, %c0_7] : memref<20x32xf32, #tpu.memory_space<vmem>>, vector<20x32xf32>
    %c0_8 = arith.constant 0 : index
    %c0_9 = arith.constant 0 : index
    %13 = vector.load %arg7[%c0_8, %c0_9] : memref<1x20xf32, #tpu.memory_space<vmem>>, vector<1x20xf32>
    %c0_10 = arith.constant 0 : index
    %c0_11 = arith.constant 0 : index
    %14 = vector.load %arg2[%c0_10, %c0_11] : memref<8x128xf32, #tpu.memory_space<vmem>>, vector<1x128xf32>
    %15 = vector.broadcast %14 : vector<1x128xf32> to vector<32x128xf32>
    %16 = arith.mulf %15, %5 : vector<32x128xf32>
    %17 = arith.addf %16, %8 : vector<32x128xf32>
    %cst = arith.constant 0.000000e+00 : f32
    %18 = vector.broadcast %cst : f32 to vector<32x128xf32>
    %19 = arith.maximumf %17, %18 : vector<32x128xf32>
    %cst_12 = arith.constant dense<0.000000e+00> : vector<20x128xf32>
    %20 = tpu.matmul %12, %19, %cst_12 {dimension_numbers = #tpu.dot_dimension_numbers<[1], [0], [0], [1], [0, 0, 1, 1], [], []>} : vector<20x32xf32>, vector<32x128xf32>, vector<20x128xf32> -> vector<20x128xf32>
    %21 = arith.addf %20, %11 : vector<20x128xf32>
    %cst_13 = arith.constant 0.000000e+00 : f32
    %22 = vector.broadcast %cst_13 : f32 to vector<20x128xf32>
    %23 = arith.maximumf %21, %22 : vector<20x128xf32>
    %cst_14 = arith.constant dense<0.000000e+00> : vector<1x128xf32>
    %24 = tpu.matmul %13, %23, %cst_14 {dimension_numbers = #tpu.dot_dimension_numbers<[1], [0], [0], [1], [0, 0, 1, 1], [], []>} : vector<1x20xf32>, vector<20x128xf32>, vector<1x128xf32> -> vector<1x128xf32>
    %c0_15 = arith.constant 0 : index
    %c0_16 = arith.constant 0 : index
    %25 = vector.load %arg10[%c0_15, %c0_16] : memref<8x128xf32, #tpu.memory_space<vmem>>, vector<1x128xf32>
    %26 = arith.addf %25, %24 : vector<1x128xf32>
    %c0_17 = arith.constant 0 : index
    %c0_18 = arith.constant 0 : index
    %27 = vector.load %arg10[%c0_17, %c0_18] : memref<8x128xf32, #tpu.memory_space<vmem>>, vector<1x128xf32>
    tpu.vector_store %arg10[%c0_17, %c0_18], %26 {strides = array<i32>} : memref<8x128xf32, #tpu.memory_space<vmem>>, vector<1x128xf32>,
    %c1 = arith.constant 1 : index
    %c0_19 = arith.constant 0 : index
    %28 = vector.load %arg2[%c1, %c0_19] : memref<8x128xf32, #tpu.memory_space<vmem>>, vector<1x128xf32>
    %29 = vector.broadcast %28 : vector<1x128xf32> to vector<32x128xf32>
    %30 = arith.mulf %29, %5 : vector<32x128xf32>
    %31 = arith.addf %30, %8 : vector<32x128xf32>
    %cst_20 = arith.constant 0.000000e+00 : f32
    %32 = vector.broadcast %cst_20 : f32 to vector<32x128xf32>
    %33 = arith.maximumf %31, %32 : vector<32x128xf32>
    %cst_21 = arith.constant dense<0.000000e+00> : vector<20x128xf32>
    %34 = tpu.matmul %12, %33, %cst_21 {dimension_numbers = #tpu.dot_dimension_numbers<[1], [0], [0], [1], [0, 0, 1, 1], [], []>} : vector<20x32xf32>, vector<32x128xf32>, vector<20x128xf32> -> vector<20x128xf32>
    %35 = arith.addf %34, %11 : vector<20x128xf32>
    %cst_22 = arith.constant 0.000000e+00 : f32
    %36 = vector.broadcast %cst_22 : f32 to vector<20x128xf32>
    %37 = arith.maximumf %35, %36 : vector<20x128xf32>
    %cst_23 = arith.constant dense<0.000000e+00> : vector<1x128xf32>
    %38 = tpu.matmul %13, %37, %cst_23 {dimension_numbers = #tpu.dot_dimension_numbers<[1], [0], [0], [1], [0, 0, 1, 1], [], []>} : vector<1x20xf32>, vector<20x128xf32>, vector<1x128xf32> -> vector<1x128xf32>
    %c1_24 = arith.constant 1 : index
    %c0_25 = arith.constant 0 : index
    %39 = vector.load %arg10[%c1_24, %c0_25] : memref<8x128xf32, #tpu.memory_space<vmem>>, vector<1x128xf32>
    %40 = arith.addf %39, %38 : vector<1x128xf32>
    %c1_26 = arith.constant 1 : index
    %c0_27 = arith.constant 0 : index
    %41 = vector.load %arg10[%c1_26, %c0_27] : memref<8x128xf32, #tpu.memory_space<vmem>>, vector<1x128xf32>
    tpu.vector_store %arg10[%c1_26, %c0_27], %40 {strides = array<i32>} : memref<8x128xf32, #tpu.memory_space<vmem>>, vector<1x128xf32>,
    %c2 = arith.constant 2 : index
    %c0_28 = arith.constant 0 : index
    %42 = vector.load %arg2[%c2, %c0_28] : memref<8x128xf32, #tpu.memory_space<vmem>>, vector<1x128xf32>
    %43 = vector.broadcast %42 : vector<1x128xf32> to vector<32x128xf32>
    %44 = arith.mulf %43, %5 : vector<32x128xf32>
    %45 = arith.addf %44, %8 : vector<32x128xf32>
    %cst_29 = arith.constant 0.000000e+00 : f32
    %46 = vector.broadcast %cst_29 : f32 to vector<32x128xf32>
    %47 = arith.maximumf %45, %46 : vector<32x128xf32>
    %cst_30 = arith.constant dense<0.000000e+00> : vector<20x128xf32>
    %48 = tpu.matmul %12, %47, %cst_30 {dimension_numbers = #tpu.dot_dimension_numbers<[1], [0], [0], [1], [0, 0, 1, 1], [], []>} : vector<20x32xf32>, vector<32x128xf32>, vector<20x128xf32> -> vector<20x128xf32>
    %49 = arith.addf %48, %11 : vector<20x128xf32>
    %cst_31 = arith.constant 0.000000e+00 : f32
    %50 = vector.broadcast %cst_31 : f32 to vector<20x128xf32>
    %51 = arith.maximumf %49, %50 : vector<20x128xf32>
    %cst_32 = arith.constant dense<0.000000e+00> : vector<1x128xf32>
    %52 = tpu.matmul %13, %51, %cst_32 {dimension_numbers = #tpu.dot_dimension_numbers<[1], [0], [0], [1], [0, 0, 1, 1], [], []>} : vector<1x20xf32>, vector<20x128xf32>, vector<1x128xf32> -> vector<1x128xf32>
    %c2_33 = arith.constant 2 : index
    %c0_34 = arith.constant 0 : index
    %53 = vector.load %arg10[%c2_33, %c0_34] : memref<8x128xf32, #tpu.memory_space<vmem>>, vector<1x128xf32>
    %54 = arith.addf %53, %52 : vector<1x128xf32>
    %c2_35 = arith.constant 2 : index
    %c0_36 = arith.constant 0 : index
    %55 = vector.load %arg10[%c2_35, %c0_36] : memref<8x128xf32, #tpu.memory_space<vmem>>, vector<1x128xf32>
    tpu.vector_store %arg10[%c2_35, %c0_36], %54 {strides = array<i32>} : memref<8x128xf32, #tpu.memory_space<vmem>>, vector<1x128xf32>,
    %c3 = arith.constant 3 : index
    %c0_37 = arith.constant 0 : index
    %56 = vector.load %arg2[%c3, %c0_37] : memref<8x128xf32, #tpu.memory_space<vmem>>, vector<1x128xf32>
    %57 = vector.broadcast %56 : vector<1x128xf32> to vector<32x128xf32>
    %58 = arith.mulf %57, %5 : vector<32x128xf32>
    %59 = arith.addf %58, %8 : vector<32x128xf32>
    %cst_38 = arith.constant 0.000000e+00 : f32
    %60 = vector.broadcast %cst_38 : f32 to vector<32x128xf32>
    %61 = arith.maximumf %59, %60 : vector<32x128xf32>
    %cst_39 = arith.constant dense<0.000000e+00> : vector<20x128xf32>
    %62 = tpu.matmul %12, %61, %cst_39 {dimension_numbers = #tpu.dot_dimension_numbers<[1], [0], [0], [1], [0, 0, 1, 1], [], []>} : vector<20x32xf32>, vector<32x128xf32>, vector<20x128xf32> -> vector<20x128xf32>
    %63 = arith.addf %62, %11 : vector<20x128xf32>
    %cst_40 = arith.constant 0.000000e+00 : f32
    %64 = vector.broadcast %cst_40 : f32 to vector<20x128xf32>
    %65 = arith.maximumf %63, %64 : vector<20x128xf32>
    %cst_41 = arith.constant dense<0.000000e+00> : vector<1x128xf32>
    %66 = tpu.matmul %13, %65, %cst_41 {dimension_numbers = #tpu.dot_dimension_numbers<[1], [0], [0], [1], [0, 0, 1, 1], [], []>} : vector<1x20xf32>, vector<20x128xf32>, vector<1x128xf32> -> vector<1x128xf32>
    %c3_42 = arith.constant 3 : index
    %c0_43 = arith.constant 0 : index
    %67 = vector.load %arg10[%c3_42, %c0_43] : memref<8x128xf32, #tpu.memory_space<vmem>>, vector<1x128xf32>
    %68 = arith.addf %67, %66 : vector<1x128xf32>
    %c3_44 = arith.constant 3 : index
    %c0_45 = arith.constant 0 : index
    %69 = vector.load %arg10[%c3_44, %c0_45] : memref<8x128xf32, #tpu.memory_space<vmem>>, vector<1x128xf32>
    tpu.vector_store %arg10[%c3_44, %c0_45], %68 {strides = array<i32>} : memref<8x128xf32, #tpu.memory_space<vmem>>, vector<1x128xf32>,
    %c4 = arith.constant 4 : index
    %c0_46 = arith.constant 0 : index
    %70 = vector.load %arg2[%c4, %c0_46] : memref<8x128xf32, #tpu.memory_space<vmem>>, vector<1x128xf32>
    %71 = vector.broadcast %70 : vector<1x128xf32> to vector<32x128xf32>
    %72 = arith.mulf %71, %5 : vector<32x128xf32>
    %73 = arith.addf %72, %8 : vector<32x128xf32>
    %cst_47 = arith.constant 0.000000e+00 : f32
    %74 = vector.broadcast %cst_47 : f32 to vector<32x128xf32>
    %75 = arith.maximumf %73, %74 : vector<32x128xf32>
    %cst_48 = arith.constant dense<0.000000e+00> : vector<20x128xf32>
    %76 = tpu.matmul %12, %75, %cst_48 {dimension_numbers = #tpu.dot_dimension_numbers<[1], [0], [0], [1], [0, 0, 1, 1], [], []>} : vector<20x32xf32>, vector<32x128xf32>, vector<20x128xf32> -> vector<20x128xf32>
    %77 = arith.addf %76, %11 : vector<20x128xf32>
    %cst_49 = arith.constant 0.000000e+00 : f32
    %78 = vector.broadcast %cst_49 : f32 to vector<20x128xf32>
    %79 = arith.maximumf %77, %78 : vector<20x128xf32>
    %cst_50 = arith.constant dense<0.000000e+00> : vector<1x128xf32>
    %80 = tpu.matmul %13, %79, %cst_50 {dimension_numbers = #tpu.dot_dimension_numbers<[1], [0], [0], [1], [0, 0, 1, 1], [], []>} : vector<1x20xf32>, vector<20x128xf32>, vector<1x128xf32> -> vector<1x128xf32>
    %c4_51 = arith.constant 4 : index
    %c0_52 = arith.constant 0 : index
    %81 = vector.load %arg10[%c4_51, %c0_52] : memref<8x128xf32, #tpu.memory_space<vmem>>, vector<1x128xf32>
    %82 = arith.addf %81, %80 : vector<1x128xf32>
    %c4_53 = arith.constant 4 : index
    %c0_54 = arith.constant 0 : index
    %83 = vector.load %arg10[%c4_53, %c0_54] : memref<8x128xf32, #tpu.memory_space<vmem>>, vector<1x128xf32>
    tpu.vector_store %arg10[%c4_53, %c0_54], %82 {strides = array<i32>} : memref<8x128xf32, #tpu.memory_space<vmem>>, vector<1x128xf32>,
    %c5 = arith.constant 5 : index
    %c0_55 = arith.constant 0 : index
    %84 = vector.load %arg2[%c5, %c0_55] : memref<8x128xf32, #tpu.memory_space<vmem>>, vector<1x128xf32>
    %85 = vector.broadcast %84 : vector<1x128xf32> to vector<32x128xf32>
    %86 = arith.mulf %85, %5 : vector<32x128xf32>
    %87 = arith.addf %86, %8 : vector<32x128xf32>
    %cst_56 = arith.constant 0.000000e+00 : f32
    %88 = vector.broadcast %cst_56 : f32 to vector<32x128xf32>
    %89 = arith.maximumf %87, %88 : vector<32x128xf32>
    %cst_57 = arith.constant dense<0.000000e+00> : vector<20x128xf32>
    %90 = tpu.matmul %12, %89, %cst_57 {dimension_numbers = #tpu.dot_dimension_numbers<[1], [0], [0], [1], [0, 0, 1, 1], [], []>} : vector<20x32xf32>, vector<32x128xf32>, vector<20x128xf32> -> vector<20x128xf32>
    %91 = arith.addf %90, %11 : vector<20x128xf32>
    %cst_58 = arith.constant 0.000000e+00 : f32
    %92 = vector.broadcast %cst_58 : f32 to vector<20x128xf32>
    %93 = arith.maximumf %91, %92 : vector<20x128xf32>
    %cst_59 = arith.constant dense<0.000000e+00> : vector<1x128xf32>
    %94 = tpu.matmul %13, %93, %cst_59 {dimension_numbers = #tpu.dot_dimension_numbers<[1], [0], [0], [1], [0, 0, 1, 1], [], []>} : vector<1x20xf32>, vector<20x128xf32>, vector<1x128xf32> -> vector<1x128xf32>
    %c5_60 = arith.constant 5 : index
    %c0_61 = arith.constant 0 : index
    %95 = vector.load %arg10[%c5_60, %c0_61] : memref<8x128xf32, #tpu.memory_space<vmem>>, vector<1x128xf32>
    %96 = arith.addf %95, %94 : vector<1x128xf32>
    %c5_62 = arith.constant 5 : index
    %c0_63 = arith.constant 0 : index
    %97 = vector.load %arg10[%c5_62, %c0_63] : memref<8x128xf32, #tpu.memory_space<vmem>>, vector<1x128xf32>
    tpu.vector_store %arg10[%c5_62, %c0_63], %96 {strides = array<i32>} : memref<8x128xf32, #tpu.memory_space<vmem>>, vector<1x128xf32>,
    %c6 = arith.constant 6 : index
    %c0_64 = arith.constant 0 : index
    %98 = vector.load %arg2[%c6, %c0_64] : memref<8x128xf32, #tpu.memory_space<vmem>>, vector<1x128xf32>
    %99 = vector.broadcast %98 : vector<1x128xf32> to vector<32x128xf32>
    %100 = arith.mulf %99, %5 : vector<32x128xf32>
    %101 = arith.addf %100, %8 : vector<32x128xf32>
    %cst_65 = arith.constant 0.000000e+00 : f32
    %102 = vector.broadcast %cst_65 : f32 to vector<32x128xf32>
    %103 = arith.maximumf %101, %102 : vector<32x128xf32>
    %cst_66 = arith.constant dense<0.000000e+00> : vector<20x128xf32>
    %104 = tpu.matmul %12, %103, %cst_66 {dimension_numbers = #tpu.dot_dimension_numbers<[1], [0], [0], [1], [0, 0, 1, 1], [], []>} : vector<20x32xf32>, vector<32x128xf32>, vector<20x128xf32> -> vector<20x128xf32>
    %105 = arith.addf %104, %11 : vector<20x128xf32>
    %cst_67 = arith.constant 0.000000e+00 : f32
    %106 = vector.broadcast %cst_67 : f32 to vector<20x128xf32>
    %107 = arith.maximumf %105, %106 : vector<20x128xf32>
    %cst_68 = arith.constant dense<0.000000e+00> : vector<1x128xf32>
    %108 = tpu.matmul %13, %107, %cst_68 {dimension_numbers = #tpu.dot_dimension_numbers<[1], [0], [0], [1], [0, 0, 1, 1], [], []>} : vector<1x20xf32>, vector<20x128xf32>, vector<1x128xf32> -> vector<1x128xf32>
    %c6_69 = arith.constant 6 : index
    %c0_70 = arith.constant 0 : index
    %109 = vector.load %arg10[%c6_69, %c0_70] : memref<8x128xf32, #tpu.memory_space<vmem>>, vector<1x128xf32>
    %110 = arith.addf %109, %108 : vector<1x128xf32>
    %c6_71 = arith.constant 6 : index
    %c0_72 = arith.constant 0 : index
    %111 = vector.load %arg10[%c6_71, %c0_72] : memref<8x128xf32, #tpu.memory_space<vmem>>, vector<1x128xf32>
    tpu.vector_store %arg10[%c6_71, %c0_72], %110 {strides = array<i32>} : memref<8x128xf32, #tpu.memory_space<vmem>>, vector<1x128xf32>,
    %c7 = arith.constant 7 : index
    %c0_73 = arith.constant 0 : index
    %112 = vector.load %arg2[%c7, %c0_73] : memref<8x128xf32, #tpu.memory_space<vmem>>, vector<1x128xf32>
    %113 = vector.broadcast %112 : vector<1x128xf32> to vector<32x128xf32>
    %114 = arith.mulf %113, %5 : vector<32x128xf32>
    %115 = arith.addf %114, %8 : vector<32x128xf32>
    %cst_74 = arith.constant 0.000000e+00 : f32
    %116 = vector.broadcast %cst_74 : f32 to vector<32x128xf32>
    %117 = arith.maximumf %115, %116 : vector<32x128xf32>
    %cst_75 = arith.constant dense<0.000000e+00> : vector<20x128xf32>
    %118 = tpu.matmul %12, %117, %cst_75 {dimension_numbers = #tpu.dot_dimension_numbers<[1], [0], [0], [1], [0, 0, 1, 1], [], []>} : vector<20x32xf32>, vector<32x128xf32>, vector<20x128xf32> -> vector<20x128xf32>
    %119 = arith.addf %118, %11 : vector<20x128xf32>
    %cst_76 = arith.constant 0.000000e+00 : f32
    %120 = vector.broadcast %cst_76 : f32 to vector<20x128xf32>
    %121 = arith.maximumf %119, %120 : vector<20x128xf32>
    %cst_77 = arith.constant dense<0.000000e+00> : vector<1x128xf32>
    %122 = tpu.matmul %13, %121, %cst_77 {dimension_numbers = #tpu.dot_dimension_numbers<[1], [0], [0], [1], [0, 0, 1, 1], [], []>} : vector<1x20xf32>, vector<20x128xf32>, vector<1x128xf32> -> vector<1x128xf32>
    %c7_78 = arith.constant 7 : index
    %c0_79 = arith.constant 0 : index
    %123 = vector.load %arg10[%c7_78, %c0_79] : memref<8x128xf32, #tpu.memory_space<vmem>>, vector<1x128xf32>
    %124 = arith.addf %123, %122 : vector<1x128xf32>
    %c7_80 = arith.constant 7 : index
    %c0_81 = arith.constant 0 : index
    %125 = vector.load %arg10[%c7_80, %c0_81] : memref<8x128xf32, #tpu.memory_space<vmem>>, vector<1x128xf32>
    tpu.vector_store %arg10[%c7_80, %c0_81], %124 {strides = array<i32>} : memref<8x128xf32, #tpu.memory_space<vmem>>, vector<1x128xf32>,
    %c0_i32_82 = arith.constant 0 : i32
    %126 = arith.cmpi eq, %arg1, %c0_i32_82 : i32
    %127 = arith.extui %126 : i1 to i32
    %c0_i32_83 = arith.constant 0 : i32
    %128 = arith.cmpi ne, %127, %c0_i32_83 : i32
    scf.if %128 {
      %c0_84 = arith.constant 0 : index
      %c0_85 = arith.constant 0 : index
      %129 = vector.load %arg8[%c0_84, %c0_85] : memref<1x1xf32, #tpu.memory_space<vmem>>, vector<1x1xf32>
      %cst_86 = arith.constant 8.000000e+00 : f32
      %130 = vector.broadcast %cst_86 : f32 to vector<1x1xf32>
      %131 = arith.mulf %130, %129 : vector<1x1xf32>
      %c0_87 = arith.constant 0 : index
      %c0_88 = arith.constant 0 : index
      %132 = vector.load %arg4[%c0_87, %c0_88] : memref<32x1xf32, #tpu.memory_space<vmem>>, vector<32x1xf32>
      %cst_89 = arith.constant 0.000000e+00 : f32
      %133 = vector.broadcast %cst_89 : f32 to vector<32x1xf32>
      %134 = arith.maximumf %132, %133 : vector<32x1xf32>
      %cst_90 = arith.constant dense<0.000000e+00> : vector<20x1xf32>
      %135 = tpu.matmul %12, %134, %cst_90 {dimension_numbers = #tpu.dot_dimension_numbers<[1], [0], [0], [1], [0, 0, 1, 1], [], []>} : vector<20x32xf32>, vector<32x1xf32>, vector<20x1xf32> -> vector<20x1xf32>
      %c0_91 = arith.constant 0 : index
      %c0_92 = arith.constant 0 : index
      %136 = vector.load %arg6[%c0_91, %c0_92] : memref<20x1xf32, #tpu.memory_space<vmem>>, vector<20x1xf32>
      %137 = arith.addf %135, %136 : vector<20x1xf32>
      %cst_93 = arith.constant 0.000000e+00 : f32
      %138 = vector.broadcast %cst_93 : f32 to vector<20x1xf32>
      %139 = arith.maximumf %137, %138 : vector<20x1xf32>
      %cst_94 = arith.constant dense<0.000000e+00> : vector<1x1xf32>
      %140 = tpu.matmul %13, %139, %cst_94 {dimension_numbers = #tpu.dot_dimension_numbers<[1], [0], [0], [1], [0, 0, 1, 1], [], []>} : vector<1x20xf32>, vector<20x1xf32>, vector<1x1xf32> -> vector<1x1xf32>
      %cst_95 = arith.constant 1.200000e+02 : f32
      %141 = vector.broadcast %cst_95 : f32 to vector<1x1xf32>
      %142 = arith.mulf %141, %140 : vector<1x1xf32>
      %143 = arith.subf %131, %142 : vector<1x1xf32>
      %c0_96 = arith.constant 0 : index
      %c0_97 = arith.constant 0 : index
      %144 = vector.load %arg10[%c0_96, %c0_97] : memref<8x128xf32, #tpu.memory_space<vmem>>, vector<8x128xf32>
      %cst_98 = arith.constant dense<0.000000e+00> : vector<8xf32>
      %145 = vector.multi_reduction <add>, %144, %cst_98 [1] : vector<8x128xf32> to vector<8xf32>
      %146 = vector.shape_cast %145 : vector<8xf32> to vector<8x1xf32>
      %147 = vector.broadcast %143 : vector<1x1xf32> to vector<8x1xf32>
      %148 = arith.addf %146, %147 : vector<8x1xf32>
      %c0_99 = arith.constant 0 : index
      %c0_100 = arith.constant 0 : index
      %149 = vector.load %arg9[%c0_99, %c0_100] : memref<8x1xf32, #tpu.memory_space<vmem>>, vector<8x1xf32>
      tpu.vector_store %arg9[%c0_99, %c0_100], %148 {strides = array<i32>} : memref<8x1xf32, #tpu.memory_space<vmem>>, vector<8x1xf32>,
    } else {
    }
    return
  }
  func.func @transform_0(%arg0: i32, %arg1: i32) -> (i32, i32) {
    %c0_i32 = arith.constant 0 : i32
    return %arg0, %arg1 : i32, i32
  }
  func.func @transform_1(%arg0: i32, %arg1: i32) -> (i32, i32) {
    %c0_i32 = arith.constant 0 : i32
    %c0_i32_0 = arith.constant 0 : i32
    %c0_i32_1 = arith.constant 0 : i32
    return %c0_i32, %c0_i32_0 : i32, i32
  }
  func.func @transform_2(%arg0: i32, %arg1: i32) -> (i32, i32) {
    %c0_i32 = arith.constant 0 : i32
    %c0_i32_0 = arith.constant 0 : i32
    %c0_i32_1 = arith.constant 0 : i32
    return %c0_i32, %c0_i32_0 : i32, i32
  }
  func.func @transform_3(%arg0: i32, %arg1: i32) -> (i32, i32) {
    %c0_i32 = arith.constant 0 : i32
    %c0_i32_0 = arith.constant 0 : i32
    %c0_i32_1 = arith.constant 0 : i32
    return %c0_i32, %c0_i32_0 : i32, i32
  }
  func.func @transform_4(%arg0: i32, %arg1: i32) -> (i32, i32) {
    %c0_i32 = arith.constant 0 : i32
    %c0_i32_0 = arith.constant 0 : i32
    %c0_i32_1 = arith.constant 0 : i32
    return %c0_i32, %c0_i32_0 : i32, i32
  }
  func.func @transform_5(%arg0: i32, %arg1: i32) -> (i32, i32) {
    %c0_i32 = arith.constant 0 : i32
    %c0_i32_0 = arith.constant 0 : i32
    %c0_i32_1 = arith.constant 0 : i32
    return %c0_i32, %c0_i32_0 : i32, i32
  }
  func.func @transform_6(%arg0: i32, %arg1: i32) -> (i32, i32) {
    %c0_i32 = arith.constant 0 : i32
    %c0_i32_0 = arith.constant 0 : i32
    %c0_i32_1 = arith.constant 0 : i32
    return %c0_i32, %c0_i32_0 : i32, i32
  }
  func.func @transform_7(%arg0: i32, %arg1: i32) -> (i32, i32) {
    %c0_i32 = arith.constant 0 : i32
    %c0_i32_0 = arith.constant 0 : i32
    return %arg0, %c0_i32 : i32, i32
  }
}

</mosaic_0001>

<bundles_post_ra>
// kernel: tpu_custom_call.1
= control target key start
LH: loop header
LB: loop body
LE: loop exit
PB: predicated region body
PF: predicated region fallthrough
CT: control target
= control target key end

     0   :  { %v2107_v0 = vmov 0   ;;  %v2108_v3 = vmov 0.0   ;;  %vm2109_vm0 = vmmov 0   ;;  %vm120_vm1 = vcmask 261120   ;;  %s2629_s2 = inlined_call_operand.vmem [shape: f32[32,1], index: 2, kind: input, shape index: {}]   ;;  %s2630_s1 = inlined_call_operand.vmem [shape: f32[32,1], index: 1, kind: input, shape index: {}]   ;;  %s2631_s4 = inlined_call_operand.vmem [shape: f32[20,1], index: 4, kind: input, shape index: {}]   ;;  %s2632_s0 = inlined_call_operand.vmem [shape: f32[8,128], index: 0, kind: input, shape index: {}]   ;;  %s2633_s3 = inlined_call_operand.vmem [shape: f32[20,32], index: 3, kind: input, shape index: {}]   ;;  %s2634_s5 = inlined_call_operand.vmem [shape: f32[1,20], index: 5, kind: input, shape index: {}]   ;;  %s2635_s6 = inlined_call_operand.<no memory space> [shape: f32[1,1], index: 6, kind: input, shape index: {}]   ;;  %s2636_s7 = inlined_call_operand.vmem [shape: f32[8,1], index: 7, kind: output, shape index: {}]  }
   0x1   :  { %2106 = vset.pattern.permute.xlu1 %v2107_v0  ;;  %2105 = vset.pattern.permute.xlu0 %v2107_v0  ;;  %v2153_v1 = vld [vmem:[%s2629_s2 + $0x18] sm:$0xff]  ;;  %32 = vst [vmem:[#allocation2] sm:$0xff] %v2108_v3  ;;  %v35_v4 = vld [vmem:[%s2630_s1 + $0x10] sm:$0xff]  ;;  %v34_v5 = vld [vmem:[%s2630_s1 + $0x8] sm:$0xff]  ;;  %vm217_vm2 = vcmask 1043456   ;;  %vm213_vm3 = vcmask 162816  }
   0x2   :  { %v36_v2 = vld [vmem:[%s2630_s1 + $0x18] sm:$0xff]  ;;  %78 = vperm.xlu1 %2106, %v2153_v1   ;;  %1868 = vmatprep.subr.mxu0 %v2108_v3  ;;  %v2171_v6 = vld [vmem:[%s2629_s2 + $0x10] sm:$0xff]  ;;  %v33_v7 = vld [vmem:[%s2630_s1] sm:$0xff]  ;;  %vm1710_vm4 = vcmask 7168  }
   0x3   :  { %54 = vperm.xlu0 %2105, %v36_v2   ;;  %1885 = vmatprep.subr.mxu1 %v2108_v3  ;;  %v2180_v8 = vld [vmem:[%s2629_s2 + $0x8] sm:$0xff]  ;;  %v2185_v9 = vld [vmem:[%s2629_s2] sm:$0xff]  ;;  %v83_v10 = vld [vmem:[%s2631_s4 + $0x10] sm:$0xf] }
   0x4   :  { %v2195_v11 = vld [vmem:[%s2631_s4 + $0x8] sm:$0xff]  ;;  %1876 = vmatprep.mubr.msk.f32.mxu0 %vm2109_vm0, %v2108_v3  ;;  %1891 = vmatprep.mubr.msk.f32.mxu1 %vm2109_vm0, %v2108_v3  ;;  %v2205_v12 = vld [vmem:[%s2631_s4] sm:$0xff] }
   0x5   :  { %v1716_v13 = vld [vmem:[%s2632_s0] ss:$0 sm:$0xff]  ;;  %v1722_v14 = vld [vmem:[%s2632_s0 + $0x1] ss:$0 sm:$0xff]  ;;  %v1728_v15 = vld [vmem:[%s2632_s0 + $0x2] ss:$0 sm:$0xff] }
   0x6   :  { %44 = vperm.xlu1 %2106, %v34_v5   ;;  %v1734_v16 = vld [vmem:[%s2632_s0 + $0x3] ss:$0 sm:$0xff]  ;;  %v1740_v17 = vld [vmem:[%s2632_s0 + $0x4] ss:$0 sm:$0xff]  ;;  %v2226_v18 = vld [vmem:[%s2632_s0 + $0x5] ss:$0 sm:$0xff] }
   0x7   :  { %49 = vperm.xlu0 %2105, %v35_v4   ;;  %v2231_v19 = vld [vmem:[%s2632_s0 + $0x6] ss:$0 sm:$0xff]  ;;  %v2236_v20 = vld [vmem:[%s2632_s0 + $0x7] ss:$0 sm:$0xff] }
   0xa   :  { %39 = vperm.xlu1 %2106, %v33_v7  }
   0xb   :  { %73 = vperm.xlu0 %2105, %v2171_v6  }
   0xe   :  { %63 = vperm.xlu1 %2106, %v2185_v9  }
   0xf   :  { %68 = vperm.xlu0 %2105, %v2180_v8  }
  0x12   :  { %91 = vperm.xlu1 %2106, %v2195_v11  }
  0x13   :  { %96 = vperm.xlu0 %2105, %v83_v10  }
  0x17   :  { %86 = vperm.xlu0 %2105, %v2205_v12  }
  0x7d   :  { %v79_v21 = vpop.permute.xlu1 %78 }
  0x7e   :  { %v55_v22 = vpop.permute.xlu0 %54 }
  0x7f   :  { %v111_v23 = vmul.f32 %v1716_v13, %v55_v22  ;;  %v302_v24 = vmul.f32 %v1722_v14, %v55_v22  ;;  %v478_v25 = vmul.f32 %v1728_v15, %v55_v22  ;;  %v654_v26 = vmul.f32 %v1734_v16, %v55_v22 }
  0x80   :  { %v830_v27 = vmul.f32 %v1740_v17, %v55_v22  ;;  %v1006_v28 = vmul.f32 %v2226_v18, %v55_v22  ;;  %v1182_v29 = vmul.f32 %v2231_v19, %v55_v22  ;;  %v1358_v30 = vmul.f32 %v2236_v20, %v55_v22 }
  0x81   :  { %v115_v31 = vadd.f32 %v111_v23, %v79_v21  ;;  %v2241_v32 = vadd.f32 %v302_v24, %v79_v21  ;;  %v2243_v33 = vadd.f32 %v478_v25, %v79_v21  ;;  %v2245_v34 = vadd.f32 %v654_v26, %v79_v21  ;;  %v2249_v36 = vpop.permute.xlu1 %44  ;;  %v2298_v25 = vld [vmem:[%s2633_s3] sm:$0xff] }
  0x82   :  { %v2247_v35 = vpop.permute.xlu0 %49  ;;  %v2251_v37 = vadd.f32 %v830_v27, %v79_v21  ;;  %v2253_v38 = vadd.f32 %v1006_v28, %v79_v21  ;;  %v2255_v39 = vadd.f32 %v1182_v29, %v79_v21  ;;  %v2257_v40 = vadd.f32 %v1358_v30, %v79_v21 }
  0x83   :  { %v119_v41 = vmax.f32 %v115_v31, 0.0  ;;  %v301_v42 = vmul.f32 %v1722_v14, %v2247_v35  ;;  %v300_v43 = vmul.f32 %v1722_v14, %v2249_v36  ;;  %v477_v44 = vmul.f32 %v1728_v15, %v2247_v35 }
  0x84   :  { %v110_v45 = vmul.f32 %v1716_v13, %v2247_v35  ;;  %v476_v46 = vmul.f32 %v1728_v15, %v2249_v36  ;;  %v653_v47 = vmul.f32 %v1734_v16, %v2247_v35  ;;  %v652_v48 = vmul.f32 %v1734_v16, %v2249_v36 }
  0x85   :  { %1869 = vmatpush3.msra.mxu0 %v119_v41  ;;  %v40_v50 = vpop.permute.xlu1 %39  ;;  %v829_v51 = vmul.f32 %v1740_v17, %v2247_v35  ;;  %v828_v52 = vmul.f32 %v1740_v17, %v2249_v36  ;;  %v109_v54 = vmul.f32 %v1716_v13, %v2249_v36  ;;  %v1005_v5 = vmul.f32 %v2226_v18, %v2247_v35 }
  0x86   :  { %v74_v49 = vpop.permute.xlu0 %73  ;;  %1870 = vmatprep.subr.mxu0 %v2108_v3  ;;  %v299_v56 = vmul.f32 %v1722_v14, %v40_v50  ;;  %v475_v58 = vmul.f32 %v1728_v15, %v40_v50  ;;  %v651_v60 = vmul.f32 %v1734_v16, %v40_v50  ;;  %v108_v62 = vmul.f32 %v1716_v13, %v40_v50 }
  0x87   :  { %v114_v53 = vadd.f32 %v110_v45, %v74_v49  ;;  %v2270_v55 = vadd.f32 %v301_v42, %v74_v49  ;;  %v2272_v57 = vadd.f32 %v477_v44, %v74_v49  ;;  %v2274_v59 = vadd.f32 %v653_v47, %v74_v49 }
  0x88   :  { %v2276_v63 = vadd.f32 %v829_v51, %v74_v49  ;;  %v827_v0 = vmul.f32 %v1740_v17, %v40_v50  ;;  %v1004_v7 = vmul.f32 %v2226_v18, %v2249_v36  ;;  %v2304_v28 = vadd.f32 %v1005_v5, %v74_v49 }
  0x89   :  { %v118_v61 = vmax.f32 %v114_v53, 0.0  ;;  %v64_v4 = vpop.permute.xlu1 %63  ;;  %v1003_v30 = vmul.f32 %v2226_v18, %v40_v50  ;;  %v1181_v31 = vmul.f32 %v2231_v19, %v2247_v35  ;;  %v1180_v41 = vmul.f32 %v2231_v19, %v2249_v36  ;;  %v2327_v18 = vld [vmem:[%s2633_s3 + $0x8] sm:$0xff] }
  0x8a   :  { %v69_v2 = vpop.permute.xlu0 %68  ;;  %v112_v14 = vadd.f32 %v108_v62, %v64_v4  ;;  %v2284_v21 = vadd.f32 %v299_v56, %v64_v4  ;;  %v2289_v16 = vadd.f32 %v475_v58, %v64_v4  ;;  %v2293_v22 = vadd.f32 %v651_v60, %v64_v4 }
  0x8b   :  { %1871 = vmatpush3.msra.mxu0 %v118_v61  ;;  %v113_v10 = vadd.f32 %v109_v54, %v69_v2  ;;  %v2282_v15 = vadd.f32 %v300_v43, %v69_v2  ;;  %v2287_v13 = vadd.f32 %v476_v46, %v69_v2  ;;  %v2291_v17 = vadd.f32 %v652_v48, %v69_v2 }
  0x8c   :  { %1872 = vmatprep.subr.mxu0 %v2108_v3  ;;  %v116_v24 = vmax.f32 %v112_v14, 0.0  ;;  %v2300_v26 = vadd.f32 %v828_v52, %v69_v2  ;;  %v2302_v27 = vadd.f32 %v827_v0, %v64_v4  ;;  %v2307_v29 = vadd.f32 %v1004_v7, %v69_v2 }
  0x8d   :  { %v117_v23 = vmax.f32 %v113_v10, 0.0  ;;  %v2317_v42 = vadd.f32 %v1003_v30, %v64_v4  ;;  %v2319_v43 = vadd.f32 %v1181_v31, %v74_v49  ;;  %v1179_v44 = vmul.f32 %v2231_v19, %v40_v50  ;;  %v2359_v56 = vpop.permute.xlu1 %91  ;;  %v2371_v10 = vld [vmem:[%s2634_s5] sm:$0x1] }
  0x8e   :  { %v2329_v45 = vadd.f32 %v1180_v41, %v69_v2  ;;  %v1357_v46 = vmul.f32 %v2236_v20, %v2247_v35  ;;  %v1356_v47 = vmul.f32 %v2236_v20, %v2249_v36  ;;  %v1355_v19 = vmul.f32 %v2236_v20, %v40_v50  ;;  %v2351_v35 = vld [vmem:[%s2633_s3 + $0x10] sm:$0xf] }
  0x8f   :  { %1873 = vmatpush3.msra.mxu0 %v117_v23  ;;  %v2335_v48 = vadd.f32 %v1179_v44, %v64_v4  ;;  %v310_v14 = vmax.f32 %v2241_v32, 0.0  ;;  %v309_v23 = vmax.f32 %v2270_v55, 0.0  ;;  %v307_v32 = vmax.f32 %v2284_v21, 0.0 }
  0x90   :  { %1874 = vmatprep.subr.mxu0 %v2108_v3  ;;  %v2338_v51 = vadd.f32 %v1357_v46, %v74_v49  ;;  %v2340_v52 = vadd.f32 %v1356_v47, %v69_v2  ;;  %v2344_v53 = vadd.f32 %v1355_v19, %v64_v4  ;;  %v2357_v49 = vpop.permute.xlu0 %96  ;;  %v486_v30 = vmax.f32 %v2243_v33, 0.0 }
  0x91   :  { %1875 = vmatpush3.msra.mxu0 %v116_v24  ;;  %v308_v24 = vmax.f32 %v2282_v15, 0.0  ;;  %v485_v55 = vmax.f32 %v2272_v57, 0.0  ;;  %v484_v15 = vmax.f32 %v2287_v13, 0.0  ;;  %v483_v33 = vmax.f32 %v2289_v16, 0.0  ;;  %v291_v57 = vld [vmem:[#allocation2] sm:$0x1] }
  0x92   :  { %1877 = vmatmul.mubr.msk.f32.vlgmr.msra.gmra.mxu0 %vm120_vm1, %v2298_v25  ;;  %1911 = vmatprep.subr.mxu0 %v2108_v3 }
  0x93   :  { %1879 = vmatprep.mubr.msk.f32.mxu0 %vm2109_vm0, %v2108_v3 }
  0x94   :  { %v2363_v62 = vpop.permute.xlu0 %86 }
  0x96   :  { %1880 = vmatmul.mubr.msk.f32.gmra.mxu0 %vm120_vm1, %v2327_v18 }
  0x97   :  { %1882 = vmatprep.mubr.msk.f32.mxu0 %vm2109_vm0, %v2108_v3 }
  0x9a   :  { %1883 = vmatmul.mubr.msk.f32.gmra.mxu0 %vm120_vm1, %v2351_v35 }
  0x9b   :  { %1917 = vmatprep.mubr.msk.f32.mxu0 %vm2109_vm0, %v2108_v3 }
 0x152   :  { %v196_v20 = vpop.f32.mrf.mxu0 }
 0x153   :  { %v197_v2 = vadd.f32 %v196_v20, %v2363_v62 }
 0x154   :  { %v1878_v36 = vpop.f32.mrf.mxu0 }
 0x155   :  { %v210_v7 = vmax.f32 %v197_v2, 0.0 }
 0x156   :  { %v201_v50 = vpop.f32.mrf.mxu0 }
 0x157   :  { %v202_v60 = vadd.f32 %v201_v50, %v2359_v56 }
 0x158   :  { %v1881_v54 = vpop.f32.mrf.mxu0 }
 0x159   :  { %v211_v5 = vmax.f32 %v202_v60, 0.0 }
 0x15a   :  { %v206_v58 = vpop.f32.mrf.mxu0 }
 0x15b   :  { %v207_v61 = vadd.f32 %v206_v58, %v2357_v49 }
 0x15c   :  { %v1884_v0 = vpop.f32.mrf.mxu0 }
 0x15d   :  { %v212_v4 = vmax.f32 %v207_v61, 0.0 }
 0x15f   :  { %1886 = vmatpush3.msk.msra.mxu1 %vm217_vm2, %v212_v4  ;;  %v662_v4 = vmax.f32 %v2245_v34, 0.0  ;;  %v660_v34 = vmax.f32 %v2291_v17, 0.0  ;;  %v838_v17 = vmax.f32 %v2251_v37, 0.0  ;;  %v835_v37 = vmax.f32 %v2302_v27, 0.0 }
 0x160   :  { %1887 = vmatprep.subr.mxu1 %v2108_v3 }
 0x161   :  { %1888 = vmatpush3.msra.mxu1 %v211_v5 }
 0x162   :  { %1889 = vmatprep.subr.mxu1 %v2108_v3 }
 0x163   :  { %1890 = vmatpush3.msra.mxu1 %v210_v7  ;;  %v661_v7 = vmax.f32 %v2274_v59, 0.0  ;;  %v659_v59 = vmax.f32 %v2293_v22, 0.0  ;;  %v837_v22 = vmax.f32 %v2276_v63, 0.0  ;;  %v467_v63 = vld [vmem:[#allocation2 + $0x1] sm:$0x1] }
 0x164   :  { %1892 = vmatmul.mubr.msk.f32.vlgmr.msra.gmra.mxu1 %vm213_vm3, %v2371_v10  ;;  %1894 = vmatprep.subr.mxu1 %v2108_v3 }
 0x165   :  { %1895 = vmatpush3.msra.mxu1 %v310_v14  ;;  %1902 = vmatprep.mubr.msk.f32.mxu1 %vm2109_vm0, %v2108_v3 }
 0x166   :  { %1896 = vmatprep.subr.mxu1 %v2108_v3 }
 0x167   :  { %1897 = vmatpush3.msra.mxu1 %v309_v23 }
 0x168   :  { %1898 = vmatprep.subr.mxu1 %v2108_v3 }
 0x169   :  { %1899 = vmatpush3.msra.mxu1 %v308_v24 }
 0x16a   :  { %1900 = vmatprep.subr.mxu1 %v2108_v3 }
 0x16b   :  { %1901 = vmatpush3.msra.mxu1 %v307_v32 }
 0x16c   :  { %1903 = vmatmul.mubr.msk.f32.vlgmr.msra.gmra.mxu1 %vm120_vm1, %v2298_v25  ;;  %1920 = vmatprep.subr.mxu1 %v2108_v3 }
 0x16d   :  { %1921 = vmatpush3.msra.mxu1 %v486_v30  ;;  %1905 = vmatprep.mubr.msk.f32.mxu1 %vm2109_vm0, %v2108_v3 }
 0x16e   :  { %1922 = vmatprep.subr.mxu1 %v2108_v3 }
 0x16f   :  { %1923 = vmatpush3.msra.mxu1 %v485_v55 }
 0x170   :  { %1906 = vmatmul.mubr.msk.f32.gmra.mxu1 %vm120_vm1, %v2327_v18  ;;  %1924 = vmatprep.subr.mxu1 %v2108_v3 }
 0x171   :  { %1925 = vmatpush3.msra.mxu1 %v484_v15  ;;  %1908 = vmatprep.mubr.msk.f32.mxu1 %vm2109_vm0, %v2108_v3 }
 0x172   :  { %1926 = vmatprep.subr.mxu1 %v2108_v3 }
 0x173   :  { %1927 = vmatpush3.msra.mxu1 %v483_v33 }
 0x174   :  { %1909 = vmatmul.mubr.msk.f32.gmra.mxu1 %vm120_vm1, %v2351_v35  ;;  %1937 = vmatprep.subr.mxu1 %v2108_v3 }
 0x175   :  { %1928 = vmatprep.mubr.msk.f32.mxu1 %vm2109_vm0, %v2108_v3 }
 0x178   :  { %1929 = vmatmul.mubr.msk.f32.vlgmr.msra.gmra.mxu1 %vm120_vm1, %v2298_v25 }
 0x179   :  { %1931 = vmatprep.mubr.msk.f32.mxu1 %vm2109_vm0, %v2108_v3 }
 0x17c   :  { %1932 = vmatmul.mubr.msk.f32.gmra.mxu1 %vm120_vm1, %v2327_v18 }
 0x17d   :  { %1934 = vmatprep.mubr.msk.f32.mxu1 %vm2109_vm0, %v2108_v3 }
 0x180   :  { %1935 = vmatmul.mubr.msk.f32.gmra.mxu1 %vm120_vm1, %v2351_v35 }
 0x181   :  { %1943 = vmatprep.mubr.msk.f32.mxu1 %vm2109_vm0, %v2108_v3 }
 0x224   :  { %v287_v21 = vpop.f32.mrf.mxu1 }
 0x225   :  { %v292_v13 = vadd.f32 %v291_v57, %v287_v21  ;;  %v836_v57 = vmax.f32 %v2300_v26, 0.0 }
 0x226   :  { %v1893_v16 = vpop.f32.mrf.mxu1 }
 0x227   :  { %293 = vst [vmem:[#allocation2] sm:$0x1] %v292_v13 }
 0x22c   :  { %v377_v31 = vpop.f32.mrf.mxu1 }
 0x22d   :  { %v378_v50 = vadd.f32 %v377_v31, %v2363_v62 }
 0x22e   :  { %v1904_v41 = vpop.f32.mrf.mxu1 }
 0x22f   :  { %v391_v0 = vmax.f32 %v378_v50, 0.0  ;;  %v643_v41 = vld [vmem:[#allocation2 + $0x2] sm:$0x1] }
 0x230   :  { %v382_v44 = vpop.f32.mrf.mxu1 }
 0x231   :  { %v383_v19 = vadd.f32 %v382_v44, %v2359_v56 }
 0x232   :  { %v1907_v46 = vpop.f32.mrf.mxu1 }
 0x233   :  { %v392_v60 = vmax.f32 %v383_v19, 0.0 }
 0x234   :  { %v387_v47 = vpop.f32.mrf.mxu1 }
 0x235   :  { %v388_v20 = vadd.f32 %v387_v47, %v2357_v49 }
 0x236   :  { %v1910_v36 = vpop.f32.mrf.mxu1 }
 0x237   :  { %v393_v54 = vmax.f32 %v388_v20, 0.0 }
 0x238   :  { %v553_v58 = vpop.f32.mrf.mxu1 }
 0x239   :  { %1912 = vmatpush3.msk.msra.mxu0 %vm217_vm2, %v393_v54  ;;  %v554_v30 = vadd.f32 %v553_v58, %v2363_v62 }
 0x23a   :  { %1913 = vmatprep.subr.mxu0 %v2108_v3  ;;  %v1930_v61 = vpop.f32.mrf.mxu1 }
 0x23b   :  { %1914 = vmatpush3.msra.mxu0 %v392_v60  ;;  %v567_v33 = vmax.f32 %v554_v30, 0.0 }
 0x23c   :  { %1915 = vmatprep.subr.mxu0 %v2108_v3  ;;  %v558_v2 = vpop.f32.mrf.mxu1 }
 0x23d   :  { %1916 = vmatpush3.msra.mxu0 %v391_v0  ;;  %v559_v23 = vadd.f32 %v558_v2, %v2359_v56 }
 0x23e   :  { %1918 = vmatmul.mubr.msk.f32.vlgmr.msra.gmra.mxu0 %vm213_vm3, %v2371_v10  ;;  %v1933_v5 = vpop.f32.mrf.mxu1  ;;  %1946 = vmatprep.subr.mxu0 %v2108_v3 }
 0x23f   :  { %1947 = vmatpush3.msra.mxu0 %v662_v4  ;;  %1954 = vmatprep.mubr.msk.f32.mxu0 %vm2109_vm0, %v2108_v3  ;;  %v568_v15 = vmax.f32 %v559_v23, 0.0 }
 0x240   :  { %v563_v14 = vpop.f32.mrf.mxu1  ;;  %1948 = vmatprep.subr.mxu0 %v2108_v3 }
 0x241   :  { %v564_v24 = vadd.f32 %v563_v14, %v2357_v49  ;;  %1949 = vmatpush3.msra.mxu0 %v661_v7 }
 0x242   :  { %1950 = vmatprep.subr.mxu0 %v2108_v3  ;;  %v1936_v32 = vpop.f32.mrf.mxu1 }
 0x243   :  { %v569_v55 = vmax.f32 %v564_v24, 0.0  ;;  %1951 = vmatpush3.msra.mxu0 %v660_v34 }
 0x244   :  { %1952 = vmatprep.subr.mxu0 %v2108_v3 }
 0x245   :  { %1938 = vmatpush3.msk.msra.mxu1 %vm217_vm2, %v569_v55  ;;  %1953 = vmatpush3.msra.mxu0 %v659_v59 }
 0x246   :  { %1939 = vmatprep.subr.mxu1 %v2108_v3  ;;  %1955 = vmatmul.mubr.msk.f32.vlgmr.msra.gmra.mxu0 %vm120_vm1, %v2298_v25 }
 0x247   :  { %1972 = vmatprep.subr.mxu0 %v2108_v3  ;;  %1940 = vmatpush3.msra.mxu1 %v568_v15  ;;  %v1014_v15 = vmax.f32 %v2253_v38, 0.0  ;;  %v1011_v38 = vmax.f32 %v2317_v42, 0.0  ;;  %v819_v42 = vld [vmem:[#allocation2 + $0x3] sm:$0x1] }
 0x248   :  { %1973 = vmatpush3.msra.mxu0 %v838_v17  ;;  %1941 = vmatprep.subr.mxu1 %v2108_v3  ;;  %v1013_v17 = vmax.f32 %v2304_v28, 0.0  ;;  %v1189_v28 = vmax.f32 %v2319_v43, 0.0 }
 0x249   :  { %1974 = vmatprep.subr.mxu0 %v2108_v3  ;;  %1942 = vmatpush3.msra.mxu1 %v567_v33  ;;  %v1012_v33 = vmax.f32 %v2307_v29, 0.0  ;;  %v1188_v29 = vmax.f32 %v2329_v45, 0.0 }
 0x24a   :  { %1957 = vmatprep.mubr.msk.f32.mxu0 %vm2109_vm0, %v2108_v3  ;;  %1975 = vmatpush3.msra.mxu0 %v837_v22  ;;  %v1190_v22 = vmax.f32 %v2255_v39, 0.0  ;;  %v1187_v39 = vmax.f32 %v2335_v48, 0.0 }
 0x24b   :  { %1958 = vmatmul.mubr.msk.f32.gmra.mxu0 %vm120_vm1, %v2327_v18  ;;  %1976 = vmatprep.subr.mxu0 %v2108_v3 }
 0x24c   :  { %1977 = vmatpush3.msra.mxu0 %v836_v57  ;;  %1960 = vmatprep.mubr.msk.f32.mxu0 %vm2109_vm0, %v2108_v3  ;;  %v995_v57 = vld [vmem:[#allocation2 + $0x4] sm:$0x1] }
 0x24d   :  { %1978 = vmatprep.subr.mxu0 %v2108_v3  ;;  %1963 = vmatprep.subr.mxu1 %v2108_v3 }
 0x24e   :  { %1979 = vmatpush3.msra.mxu0 %v835_v37  ;;  %1944 = vmatmul.mubr.msk.f32.vlgmr.msra.gmra.mxu1 %vm213_vm3, %v2371_v10 }
 0x24f   :  { %1961 = vmatmul.mubr.msk.f32.gmra.mxu0 %vm120_vm1, %v2351_v35  ;;  %1969 = vmatprep.mubr.msk.f32.mxu1 %vm2109_vm0, %v2108_v3 }
 0x250   :  { %1980 = vmatprep.mubr.msk.f32.mxu0 %vm2109_vm0, %v2108_v3  ;;  %2015 = vmatprep.subr.mxu0 %v2108_v3 }
 0x253   :  { %1981 = vmatmul.mubr.msk.f32.vlgmr.msra.gmra.mxu0 %vm120_vm1, %v2298_v25 }
 0x254   :  { %1983 = vmatprep.mubr.msk.f32.mxu0 %vm2109_vm0, %v2108_v3 }
 0x257   :  { %1984 = vmatmul.mubr.msk.f32.gmra.mxu0 %vm120_vm1, %v2327_v18 }
 0x258   :  { %1986 = vmatprep.mubr.msk.f32.mxu0 %vm2109_vm0, %v2108_v3 }
 0x25b   :  { %1987 = vmatmul.mubr.msk.f32.gmra.mxu0 %vm120_vm1, %v2351_v35 }
 0x25c   :  { %2021 = vmatprep.mubr.msk.f32.mxu0 %vm2109_vm0, %v2108_v3 }
 0x2fe   :  { %v463_v26 = vpop.f32.mrf.mxu0 }
 0x2ff   :  { %v468_v27 = vadd.f32 %v467_v63, %v463_v26 }
 0x300   :  { %v1919_v21 = vpop.f32.mrf.mxu0 }
 0x301   :  { %469 = vst [vmem:[#allocation2 + $0x1] sm:$0x1] %v468_v27 }
 0x306   :  { %v729_v13 = vpop.f32.mrf.mxu0 }
 0x307   :  { %v730_v58 = vadd.f32 %v729_v13, %v2363_v62 }
 0x308   :  { %v1956_v16 = vpop.f32.mrf.mxu0 }
 0x309   :  { %v743_v4 = vmax.f32 %v730_v58, 0.0 }
 0x30b   :  { %v734_v31 = vpop.f32.mrf.mxu0 }
 0x30c   :  { %v735_v20 = vadd.f32 %v734_v31, %v2359_v56 }
 0x30d   :  { %v1959_v44 = vpop.f32.mrf.mxu0 }
 0x30e   :  { %v639_v46 = vpop.f32.mrf.mxu1  ;;  %v744_v0 = vmax.f32 %v735_v20, 0.0 }
 0x30f   :  { %v739_v47 = vpop.f32.mrf.mxu0  ;;  %v644_v19 = vadd.f32 %v643_v41, %v639_v46 }
 0x310   :  { %v740_v36 = vadd.f32 %v739_v47, %v2357_v49  ;;  %v1945_v50 = vpop.f32.mrf.mxu1 }
 0x311   :  { %v1962_v54 = vpop.f32.mrf.mxu0  ;;  %645 = vst [vmem:[#allocation2 + $0x2] sm:$0x1] %v644_v19 }
 0x312   :  { %v745_v60 = vmax.f32 %v740_v36, 0.0 }
 0x313   :  { %v905_v61 = vpop.f32.mrf.mxu0 }
 0x314   :  { %1964 = vmatpush3.msk.msra.mxu1 %vm217_vm2, %v745_v60  ;;  %v906_v32 = vadd.f32 %v905_v61, %v2363_v62 }
 0x315   :  { %1965 = vmatprep.subr.mxu1 %v2108_v3  ;;  %v1982_v2 = vpop.f32.mrf.mxu0 }
 0x316   :  { %1966 = vmatpush3.msra.mxu1 %v744_v0  ;;  %v919_v59 = vmax.f32 %v906_v32, 0.0  ;;  %v1364_v32 = vmax.f32 %v2340_v52, 0.0  ;;  %v1536_v52 = vmax.f32 %v2180_v8, 0.0 }
 0x317   :  { %1967 = vmatprep.subr.mxu1 %v2108_v3  ;;  %v910_v5 = vpop.f32.mrf.mxu0 }
 0x318   :  { %1968 = vmatpush3.msra.mxu1 %v743_v4  ;;  %v911_v23 = vadd.f32 %v910_v5, %v2359_v56 }
 0x319   :  { %v1985_v7 = vpop.f32.mrf.mxu0  ;;  %1970 = vmatmul.mubr.msk.f32.vlgmr.msra.gmra.mxu1 %vm213_vm3, %v2371_v10  ;;  %1989 = vmatprep.subr.mxu1 %v2108_v3 }
 0x31a   :  { %1995 = vmatprep.mubr.msk.f32.mxu1 %vm2109_vm0, %v2108_v3  ;;  %v920_v55 = vmax.f32 %v911_v23, 0.0 }
 0x31b   :  { %v915_v14 = vpop.f32.mrf.mxu0 }
 0x31c   :  { %v916_v24 = vadd.f32 %v915_v14, %v2357_v49 }
 0x31d   :  { %v1988_v34 = vpop.f32.mrf.mxu0 }
 0x31e   :  { %v921_v30 = vmax.f32 %v916_v24, 0.0  ;;  %v1366_v24 = vmax.f32 %v2257_v40, 0.0  ;;  %v1365_v34 = vmax.f32 %v2338_v51, 0.0  ;;  %v1363_v40 = vmax.f32 %v2344_v53, 0.0 }
 0x31f   :  { %v1537_v51 = vmax.f32 %v2171_v6, 0.0  ;;  %v1171_v6 = vld [vmem:[#allocation2 + $0x5] sm:$0x1] }
 0x320   :  { %1990 = vmatpush3.msk.msra.mxu1 %vm217_vm2, %v921_v30  ;;  %v1538_v30 = vmax.f32 %v2153_v1, 0.0  ;;  %v1535_v1 = vmax.f32 %v2185_v9, 0.0 }
 0x321   :  { %1991 = vmatprep.subr.mxu1 %v2108_v3 }
 0x322   :  { %1992 = vmatpush3.msra.mxu1 %v920_v55  ;;  %v1347_v55 = vld [vmem:[#allocation2 + $0x6] sm:$0x1] }
 0x323   :  { %1993 = vmatprep.subr.mxu1 %v2108_v3 }
 0x324   :  { %1994 = vmatpush3.msra.mxu1 %v919_v59 }
 0x325   :  { %1996 = vmatmul.mubr.msk.f32.vlgmr.msra.gmra.mxu1 %vm213_vm3, %v2371_v10  ;;  %1998 = vmatprep.subr.mxu1 %v2108_v3 }
 0x326   :  { %1999 = vmatpush3.msra.mxu1 %v1014_v15  ;;  %2006 = vmatprep.mubr.msk.f32.mxu1 %vm2109_vm0, %v2108_v3 }
 0x327   :  { %2000 = vmatprep.subr.mxu1 %v2108_v3 }
 0x328   :  { %2001 = vmatpush3.msra.mxu1 %v1013_v17 }
 0x329   :  { %2002 = vmatprep.subr.mxu1 %v2108_v3 }
 0x32a   :  { %2003 = vmatpush3.msra.mxu1 %v1012_v33 }
 0x32b   :  { %2004 = vmatprep.subr.mxu1 %v2108_v3 }
 0x32c   :  { %2005 = vmatpush3.msra.mxu1 %v1011_v38 }
 0x32d   :  { %2007 = vmatmul.mubr.msk.f32.vlgmr.msra.gmra.mxu1 %vm120_vm1, %v2298_v25  ;;  %2024 = vmatprep.subr.mxu1 %v2108_v3 }
 0x32e   :  { %2025 = vmatpush3.msra.mxu1 %v1190_v22  ;;  %2009 = vmatprep.mubr.msk.f32.mxu1 %vm2109_vm0, %v2108_v3 }
 0x32f   :  { %2026 = vmatprep.subr.mxu1 %v2108_v3 }
 0x330   :  { %2027 = vmatpush3.msra.mxu1 %v1189_v28 }
 0x331   :  { %2010 = vmatmul.mubr.msk.f32.gmra.mxu1 %vm120_vm1, %v2327_v18  ;;  %2028 = vmatprep.subr.mxu1 %v2108_v3 }
 0x332   :  { %2029 = vmatpush3.msra.mxu1 %v1188_v29  ;;  %2012 = vmatprep.mubr.msk.f32.mxu1 %vm2109_vm0, %v2108_v3 }
 0x333   :  { %2030 = vmatprep.subr.mxu1 %v2108_v3 }
 0x334   :  { %2031 = vmatpush3.msra.mxu1 %v1187_v39 }
 0x335   :  { %2013 = vmatmul.mubr.msk.f32.gmra.mxu1 %vm120_vm1, %v2351_v35  ;;  %2067 = vmatprep.subr.mxu1 %v2108_v3 }
 0x336   :  { %2032 = vmatprep.mubr.msk.f32.mxu1 %vm2109_vm0, %v2108_v3 }
 0x339   :  { %2033 = vmatmul.mubr.msk.f32.vlgmr.msra.gmra.mxu1 %vm120_vm1, %v2298_v25 }
 0x33a   :  { %2035 = vmatprep.mubr.msk.f32.mxu1 %vm2109_vm0, %v2108_v3 }
 0x33d   :  { %2036 = vmatmul.mubr.msk.f32.gmra.mxu1 %vm120_vm1, %v2327_v18 }
 0x33e   :  { %2038 = vmatprep.mubr.msk.f32.mxu1 %vm2109_vm0, %v2108_v3 }
 0x341   :  { %2039 = vmatmul.mubr.msk.f32.gmra.mxu1 %vm120_vm1, %v2351_v35 }
 0x342   :  { %2073 = vmatprep.mubr.msk.f32.mxu1 %vm2109_vm0, %v2108_v3 }
 0x3d9   :  { %v815_v43 = vpop.f32.mrf.mxu1 }
 0x3da   :  { %v820_v45 = vadd.f32 %v819_v42, %v815_v43 }
 0x3db   :  { %v1971_v48 = vpop.f32.mrf.mxu1 }
 0x3dc   :  { %821 = vst [vmem:[#allocation2 + $0x3] sm:$0x1] %v820_v45 }
 0x3e5   :  { %v991_v37 = vpop.f32.mrf.mxu1 }
 0x3e6   :  { %v996_v63 = vadd.f32 %v995_v57, %v991_v37 }
 0x3e7   :  { %v1997_v26 = vpop.f32.mrf.mxu1 }
 0x3e8   :  { %997 = vst [vmem:[#allocation2 + $0x4] sm:$0x1] %v996_v63 }
 0x3ed   :  { %v1081_v27 = vpop.f32.mrf.mxu1 }
 0x3ee   :  { %v1082_v47 = vadd.f32 %v1081_v27, %v2363_v62 }
 0x3ef   :  { %v2008_v21 = vpop.f32.mrf.mxu1 }
 0x3f0   :  { %v1095_v54 = vmax.f32 %v1082_v47, 0.0 }
 0x3f1   :  { %v1086_v13 = vpop.f32.mrf.mxu1 }
 0x3f2   :  { %v1087_v41 = vadd.f32 %v1086_v13, %v2359_v56 }
 0x3f3   :  { %v2011_v16 = vpop.f32.mrf.mxu1 }
 0x3f4   :  { %v1096_v36 = vmax.f32 %v1087_v41, 0.0 }
 0x3f5   :  { %v1091_v31 = vpop.f32.mrf.mxu1 }
 0x3f6   :  { %v1092_v44 = vadd.f32 %v1091_v31, %v2357_v49 }
 0x3f7   :  { %v2014_v46 = vpop.f32.mrf.mxu1 }
 0x3f8   :  { %v1097_v19 = vmax.f32 %v1092_v44, 0.0 }
 0x3f9   :  { %v1257_v20 = vpop.f32.mrf.mxu1 }
 0x3fa   :  { %2016 = vmatpush3.msk.msra.mxu0 %vm217_vm2, %v1097_v19  ;;  %v1258_v5 = vadd.f32 %v1257_v20, %v2363_v62 }
 0x3fb   :  { %2017 = vmatprep.subr.mxu0 %v2108_v3  ;;  %v2034_v50 = vpop.f32.mrf.mxu1 }
 0x3fc   :  { %2018 = vmatpush3.msra.mxu0 %v1096_v36  ;;  %v1271_v23 = vmax.f32 %v1258_v5, 0.0  ;;  %v1704_v36 = vlaneseq }
 0x3fd   :  { %2019 = vmatprep.subr.mxu0 %v2108_v3  ;;  %v1262_v58 = vpop.f32.mrf.mxu1 }
 0x3fe   :  { %2020 = vmatpush3.msra.mxu0 %v1095_v54  ;;  %v1263_v0 = vadd.f32 %v1262_v58, %v2359_v56  ;;  %v1705_v58 = vshrl.u32 %v1704_v36, 7 }
 0x3ff   :  { %v2037_v60 = vpop.f32.mrf.mxu1  ;;  %2022 = vmatmul.mubr.msk.f32.vlgmr.msra.gmra.mxu0 %vm213_vm3, %v2371_v10  ;;  %2041 = vmatprep.subr.mxu0 %v2108_v3 }
 0x400   :  { %2047 = vmatprep.mubr.msk.f32.mxu0 %vm2109_vm0, %v2108_v3  ;;  %v1272_v14 = vmax.f32 %v1263_v0, 0.0  ;;  %v1706_v60 = vsub.s32 0, %v1705_v58 }
 0x401   :  { %v1267_v61 = vpop.f32.mrf.mxu1 }
 0x402   :  { %v1268_v2 = vadd.f32 %v1267_v61, %v2357_v49 }
 0x403   :  { %v2040_v4 = vpop.f32.mrf.mxu1 }
 0x404   :  { %v1273_v7 = vmax.f32 %v1268_v2, 0.0 }
 0x406   :  { %2042 = vmatpush3.msk.msra.mxu0 %vm217_vm2, %v1273_v7 }
 0x407   :  { %2043 = vmatprep.subr.mxu0 %v2108_v3 }
 0x408   :  { %2044 = vmatpush3.msra.mxu0 %v1272_v14 }
 0x409   :  { %2045 = vmatprep.subr.mxu0 %v2108_v3 }
 0x40a   :  { %2046 = vmatpush3.msra.mxu0 %v1271_v23 }
 0x40b   :  { %2048 = vmatmul.mubr.msk.f32.vlgmr.msra.gmra.mxu0 %vm213_vm3, %v2371_v10  ;;  %2050 = vmatprep.subr.mxu0 %v2108_v3 }
 0x40c   :  { %2051 = vmatpush3.msra.mxu0 %v1366_v24  ;;  %2058 = vmatprep.mubr.msk.f32.mxu0 %vm2109_vm0, %v2108_v3 }
 0x40d   :  { %2052 = vmatprep.subr.mxu0 %v2108_v3 }
 0x40e   :  { %2053 = vmatpush3.msra.mxu0 %v1365_v34 }
 0x40f   :  { %2054 = vmatprep.subr.mxu0 %v2108_v3 }
 0x410   :  { %2055 = vmatpush3.msra.mxu0 %v1364_v32 }
 0x411   :  { %2056 = vmatprep.subr.mxu0 %v2108_v3 }
 0x412   :  { %2057 = vmatpush3.msra.mxu0 %v1363_v40 }
 0x413   :  { %2059 = vmatmul.mubr.msk.f32.vlgmr.msra.gmra.mxu0 %vm120_vm1, %v2298_v25  ;;  %2076 = vmatprep.subr.mxu0 %v2108_v3 }
 0x414   :  { %2061 = vmatprep.mubr.msk.f32.mxu0 %vm2109_vm0, %v2108_v3  ;;  %2077 = vmatpush3.msra.mxu0 %v1538_v30 }
 0x415   :  { %2078 = vmatprep.subr.mxu0 %v2108_v3 }
 0x416   :  { %2079 = vmatpush3.msra.mxu0 %v1537_v51 }
 0x417   :  { %2062 = vmatmul.mubr.msk.f32.gmra.mxu0 %vm120_vm1, %v2327_v18  ;;  %2080 = vmatprep.subr.mxu0 %v2108_v3 }
 0x418   :  { %2064 = vmatprep.mubr.msk.f32.mxu0 %vm2109_vm0, %v2108_v3  ;;  %2081 = vmatpush3.msra.mxu0 %v1536_v52 }
 0x419   :  { %2082 = vmatprep.subr.mxu0 %v2108_v3 }
 0x41a   :  { %2083 = vmatpush3.msra.mxu0 %v1535_v1 }
 0x41b   :  { %2065 = vmatmul.mubr.msk.f32.gmra.mxu0 %vm120_vm1, %v2351_v35 }
 0x41c   :  { %2084 = vmatprep.mubr.msk.f32.mxu0 %vm2109_vm0, %v2108_v3 }
 0x41f   :  { %2085 = vmatmul.mubr.msk.f32.vlgmr.msra.gmra.mxu0 %vm120_vm1, %v2298_v25 }
 0x420   :  { %2087 = vmatprep.mubr.msk.f32.mxu0 %vm2109_vm0, %v2108_v3 }
 0x423   :  { %2088 = vmatmul.mubr.msk.f32.gmra.mxu0 %vm120_vm1, %v2327_v18 }
 0x424   :  { %2090 = vmatprep.mubr.msk.f32.mxu0 %vm2109_vm0, %v2108_v3 }
 0x427   :  { %2091 = vmatmul.mubr.msk.f32.gmra.mxu0 %vm120_vm1, %v2351_v35 }
 0x4bf   :  { %v1167_v8 = vpop.f32.mrf.mxu0 }
 0x4c0   :  { %v1172_v9 = vadd.f32 %v1171_v6, %v1167_v8 }
 0x4c1   :  { %v2023_v53 = vpop.f32.mrf.mxu0 }
 0x4c2   :  { %1173 = vst [vmem:[#allocation2 + $0x5] sm:$0x1] %v1172_v9 }
 0x4cb   :  { %v1343_v59 = vpop.f32.mrf.mxu0 }
 0x4cc   :  { %v1348_v25 = vadd.f32 %v1347_v55, %v1343_v59 }
 0x4cd   :  { %v2049_v15 = vpop.f32.mrf.mxu0 }
 0x4ce   :  { %1349 = vst [vmem:[#allocation2 + $0x6] sm:$0x1] %v1348_v25 }
 0x4d3   :  { %v1433_v17 = vpop.f32.mrf.mxu0 }
 0x4d4   :  { %v1434_v39 = vadd.f32 %v1433_v17, %v2363_v62 }
 0x4d5   :  { %v2060_v33 = vpop.f32.mrf.mxu0 }
 0x4d6   :  { %v1447_v57 = vmax.f32 %v1434_v39, 0.0 }
 0x4d7   :  { %v1438_v38 = vpop.f32.mrf.mxu0 }
 0x4d8   :  { %v1439_v28 = vadd.f32 %v1438_v38, %v2359_v56  ;;  %v1541_v56 = vld [vmem:[%s2631_s4 + $0x10] sm:$0xf] }
 0x4d9   :  { %v2063_v18 = vpop.f32.mrf.mxu0 }
 0x4da   :  { %v1448_v45 = vmax.f32 %v1439_v28, 0.0 }
 0x4db   :  { %v1443_v22 = vpop.f32.mrf.mxu0 }
 0x4dc   :  { %v1444_v29 = vadd.f32 %v1443_v22, %v2357_v49 }
 0x4dd   :  { %v2066_v35 = vpop.f32.mrf.mxu0 }
 0x4de   :  { %v1449_v42 = vmax.f32 %v1444_v29, 0.0 }
 0x4df   :  { %v1608_v43 = vpop.f32.mrf.mxu0 }
 0x4e0   :  { %2068 = vmatpush3.msk.msra.mxu1 %vm217_vm2, %v1449_v42  ;;  %v1609_v26 = vadd.f32 %v1608_v43, %v2205_v12  ;;  %v1523_v12 = vld [vmem:[#allocation2 + $0x7] sm:$0x1] }
 0x4e1   :  { %2069 = vmatprep.subr.mxu1 %v2108_v3  ;;  %v2086_v48 = vpop.f32.mrf.mxu0 }
 0x4e2   :  { %2070 = vmatpush3.msra.mxu1 %v1448_v45  ;;  %v1622_v31 = vmax.f32 %v1609_v26, 0.0 }
 0x4e3   :  { %2071 = vmatprep.subr.mxu1 %v2108_v3  ;;  %v1613_v37 = vpop.f32.mrf.mxu0 }
 0x4e4   :  { %2072 = vmatpush3.msra.mxu1 %v1447_v57  ;;  %v1614_v62 = vadd.f32 %v1613_v37, %v2195_v11  ;;  %v12_v11 = vstv %s2635_s6 }
 0x4e5   :  { %2074 = vmatmul.mubr.msk.f32.vlgmr.msra.gmra.mxu1 %vm213_vm3, %v2371_v10  ;;  %v2089_v49 = vpop.f32.mrf.mxu0  ;;  %2093 = vmatprep.subr.mxu1 %v2108_v3  ;;  %13 = vst [vmem:[#allocation3] sm:$0x1] %v12_v11 }
 0x4e6   :  { %2099 = vmatprep.mubr.msk.f32.mxu1 %vm2109_vm0, %v2108_v3  ;;  %v1623_v13 = vmax.f32 %v1614_v62, 0.0 }
 0x4e7   :  { %v1618_v63 = vpop.f32.mrf.mxu0 }
 0x4e8   :  { %v1619_v27 = vadd.f32 %v1618_v63, %v1541_v56 }
 0x4e9   :  { %v2092_v21 = vpop.f32.mrf.mxu0 }
 0x4ea   :  { %v1624_v16 = vmax.f32 %v1619_v27, 0.0 }
 0x4ec   :  { %2094 = vmatpush3.msk.msra.mxu1 %vm217_vm2, %v1624_v16 }
 0x4ed   :  { %2095 = vmatprep.subr.mxu1 %v2108_v3 }
 0x4ee   :  { %2096 = vmatpush3.msra.mxu1 %v1623_v13 }
 0x4ef   :  { %2097 = vmatprep.subr.mxu1 %v2108_v3  ;;  %v1529_v3 = vld [vmem:[#allocation3] sm:$0x1] }
 0x4f0   :  { %2098 = vmatpush3.msra.mxu1 %v1622_v31  ;;  %v1530_v50 = vmul.f32 8.0, %v1529_v3 }
 0x4f1   :  { %2100 = vmatmul.mubr.msk.f32.vlgmr.msra.gmra.mxu1 %vm213_vm3, %v2371_v10 }
 0x5a5   :  { %v1519_v41 = vpop.f32.mrf.mxu1 }
 0x5a6   :  { %v1524_v44 = vadd.f32 %v1523_v12, %v1519_v41 }
 0x5a7   :  { %v2075_v46 = vpop.f32.mrf.mxu1 }
 0x5a8   :  { %1525 = vst [vmem:[#allocation2 + $0x7] sm:$0x1] %v1524_v44 }
 0x5af   :  { %v1700_v47 = vld [vmem:[#allocation2] sm:$0xff] }
 0x5b0   :  { %1701 = vadd.xlane.f32.xlu1 %v1700_v47 }
 0x5b1   :  { %v1694_v19 = vpop.f32.mrf.mxu1 }
 0x5b2   :  { %v1698_v54 = vmul.f32 120.0, %v1694_v19 }
 0x5b3   :  { %v2101_v20 = vpop.f32.mrf.mxu1 }
 0x5b4   :  { %v1699_v10 = vsub.f32 %v1530_v50, %v1698_v54 }
 0x5b6   :  { %v1707_v61 = vrot.slane %v1699_v10, %v1706_v60 }
 0x639   :  { %v1702_v0 = vpop.xlane.xlu1 %1701 }
 0x63a   :  { %v1709_v2 = vadd.f32 %v1707_v61, %v1702_v0 }
 0x63c   :  { %1711 = vst.msk [vmem:[%s2636_s7] sm:$0xff] %vm1710_vm4, %v1709_v2 }

</bundles_post_ra>
